<compile_context>
chip_gen: v7x
topology: tpu7x:2x2x1
jax: 0.10.0
libtpu: 0.0.40
codegen_flags: <defaults>
</compile_context>

<pallas_src>
import functools
import math

import jax
import jax.numpy as jnp
from jax import lax
from jax.experimental import pallas as pl
from jax.experimental.pallas import tpu as pltpu


NEG_INF = -1e30  # large-negative mask value (avoids NaN on fully masked rows)


def _layer_norm_f32(x, w, eps=1e-5):
    """LayerNorm without bias, computed in f32.  w has shape (1, C)."""
    mu = jnp.mean(x, axis=-1, keepdims=True)
    var = jnp.mean((x - mu) ** 2, axis=-1, keepdims=True)
    return (x - mu) * lax.rsqrt(var + eps) * w


# --------------------------------------------------------------------------
# Pass 1: LN1 + QKV projection (one row tile per grid step)
# --------------------------------------------------------------------------
def qkv_proj_kernel(x_ref, ln1w_ref, wq_ref, wk_ref, wv_ref,
                    q_ref, k_ref, v_ref, *, scale):
    xn = _layer_norm_f32(x_ref[...], ln1w_ref[...]).astype(jnp.bfloat16)
    q = jnp.dot(xn, wq_ref[...], preferred_element_type=jnp.float32)
    q_ref[...] = (q * scale).astype(jnp.bfloat16)        # fold 1/sqrt(Dh) into q
    k_ref[...] = jnp.dot(xn, wk_ref[...],
                         preferred_element_type=jnp.float32).astype(jnp.bfloat16)
    v_ref[...] = jnp.dot(xn, wv_ref[...],
                         preferred_element_type=jnp.float32).astype(jnp.bfloat16)


# --------------------------------------------------------------------------
# Pass 2: causal flash attention + attention projection + residual 1
# --------------------------------------------------------------------------
def flash_attn_kernel(q_ref, k_ref, v_ref, x_ref, waproj_ref, o_ref,
                      m_sc, l_sc, acc_sc, *, num_heads):
    TQ, C = q_ref.shape
    TK = k_ref.shape[0]
    H = num_heads
    Dh = C // H

    qi = pl.program_id(1)
    kv = pl.program_id(2)

    @pl.when(kv == 0)
    def _():
        m_sc[...] = jnp.full_like(m_sc, NEG_INF)
        l_sc[...] = jnp.zeros_like(l_sc)
        acc_sc[...] = jnp.zeros_like(acc_sc)

    def flash_update(apply_mask):
        # K/V arrive already projected (bf16) — no LN / matmul recompute here.
        q_hd = q_ref[...].reshape(TQ, H, Dh)
        k_hd = k_ref[...].reshape(TK, H, Dh)
        v_hd = v_ref[...].reshape(TK, H, Dh)
        s = jnp.einsum('qhd,khd->hqk', q_hd, k_hd,
                       preferred_element_type=jnp.float32)   # (H, TQ, TK) f32
        if apply_mask:  # only the diagonal tile pays for the iota + select
            row = lax.broadcasted_iota(jnp.int32, (TQ, TK), 0)
            col = lax.broadcasted_iota(jnp.int32, (TQ, TK), 1)
            s = jnp.where((col <= row)[None, :, :], s, NEG_INF)
        m_prev = m_sc[...]
        m_new = jnp.maximum(m_prev, jnp.max(s, axis=-1, keepdims=True))
        alpha = jnp.exp(m_prev - m_new)
        p = jnp.exp(s - m_new)
        l_sc[...] = alpha * l_sc[...] + jnp.sum(p, axis=-1, keepdims=True)
        acc_sc[...] = alpha * acc_sc[...] + jnp.einsum(
            'hqk,khd->hqd', p.astype(jnp.bfloat16), v_hd,
            preferred_element_type=jnp.float32)
        m_sc[...] = m_new

    # Causal: only kv tiles <= the query tile contribute.
    @pl.when(kv < qi)
    def _():
        flash_update(False)

    @pl.when(kv == qi)
    def _():
        flash_update(True)

    @pl.when(kv == pl.num_programs(2) - 1)
    def _():
        inv_l = pl.reciprocal(l_sc[...], approx=True)         # EUP slot, ~free
        y = acc_sc[...] * inv_l                               # (H, TQ, Dh) f32
        y = jnp.transpose(y, (1, 0, 2)).reshape(TQ, C)        # head-concat layout
        attn = jnp.dot(y.astype(jnp.bfloat16), waproj_ref[...],
                       preferred_element_type=jnp.float32)
        o_ref[...] = x_ref[...] + attn                        # residual 1 (f32)


# --------------------------------------------------------------------------
# Pass 3: LN2 + FFN (streamed weight chunks) + residual 2
# --------------------------------------------------------------------------
def mlp_kernel(x1_ref, ln2w_ref, wfc_ref, wproj_ref, o_ref, xn_sc, acc_sc):
    f = pl.program_id(2)

    @pl.when(f == 0)
    def _():
        # LN2 computed once per row tile (not once per ff chunk).
        xn_sc[...] = _layer_norm_f32(x1_ref[...], ln2w_ref[...]).astype(jnp.bfloat16)
        acc_sc[...] = jnp.zeros_like(acc_sc)

    h = jnp.dot(xn_sc[...], wfc_ref[...],
                preferred_element_type=jnp.float32)            # (TQ, FT) f32
    # exact (erf) GELU to match torch.nn.GELU() default, in f32
    h = 0.5 * h * (1.0 + lax.erf(h * (1.0 / math.sqrt(2.0))))
    acc_sc[...] += jnp.dot(h.astype(jnp.bfloat16), wproj_ref[...],
                           preferred_element_type=jnp.float32)

    @pl.when(f == pl.num_programs(2) - 1)
    def _():
        o_ref[...] = x1_ref[...] + acc_sc[...]                 # residual 2 (f32)


# --------------------------------------------------------------------------
# Wrapper
# --------------------------------------------------------------------------
def _vmem_cap_bytes():
    # Generation-aware VMEM capacity (v5e/v6e: 128 MiB, v7x: 64 MiB).
    try:
        cap = int(pltpu.get_tpu_info().vmem_capacity_bytes)
        if cap > 0:
            return cap
    except Exception:
        # Narrow guard: hardware-info query only; never changes kernel config.
        pass
    return 64 * 2 ** 20  # conservative (v7x) default


def _compiler_params(semantics, est_bytes):
    cap = _vmem_cap_bytes()
    limit = int(min(int(0.9 * cap), max(32 * 2 ** 20, 2 * est_bytes)))
    return pltpu.CompilerParams(dimension_semantics=semantics,
                                vmem_limit_bytes=limit)


def _largest_divisor_tile(n, target, quantum):
    """Largest divisor of n that is <= target and a multiple of quantum, else n."""
    if n <= target:
        return n
    t = (target // quantum) * quantum
    while t > quantum and n % t:
        t -= quantum
    return t if (t > 0 and n % t == 0) else n


def transformer_block(x, params, num_heads, *, tq=None):
    B, T, C = x.shape
    ln1_w, w_attn, w_aproj, ln2_w, w_fc, w_proj = params
    assert C % num_heads == 0
    H = num_heads
    Dh = C // H
    FF = 4 * C

    TQ = tq if tq is not None else _largest_divisor_tile(T, 256, 8)
    assert T % TQ == 0, "T must be divisible by the row/query tile size"
    NQ = T // TQ

    FT = _largest_divisor_tile(FF, 2048, 128)   # FFN weight chunk (streamed)
    NF = FF // FT

    bf16 = jnp.bfloat16
    w_q = w_attn[:, 0 * C:1 * C].astype(bf16)
    w_k = w_attn[:, 1 * C:2 * C].astype(bf16)
    w_v = w_attn[:, 2 * C:3 * C].astype(bf16)
    w_ap = w_aproj.astype(bf16)
    w_f = w_fc.astype(bf16)
    w_p = w_proj.astype(bf16)
    scale = 1.0 / math.sqrt(Dh)

    # ------------------ pass 1: LN1 + QKV projection ----------------------
    qkv_est = (2 * TQ * C * 4 + 6 * C * C * 2 + 6 * TQ * C * 2 + 4 * TQ * C * 4)
    q, k, v = pl.pallas_call(
        functools.partial(qkv_proj_kernel, scale=scale),
        out_shape=(jax.ShapeDtypeStruct((B, T, C), bf16),) * 3,
        grid_spec=pltpu.PrefetchScalarGridSpec(
            num_scalar_prefetch=0,
            grid=(B, NQ),
            in_specs=[
                pl.BlockSpec((None, TQ, C), lambda b, t: (b, t, 0)),   # x tile
                pl.BlockSpec((1, C), lambda b, t: (0, 0)),             # ln1 w
                pl.BlockSpec((C, C), lambda b, t: (0, 0)),             # W_q
                pl.BlockSpec((C, C), lambda b, t: (0, 0)),             # W_k
                pl.BlockSpec((C, C), lambda b, t: (0, 0)),             # W_v
            ],
            out_specs=(
                pl.BlockSpec((None, TQ, C), lambda b, t: (b, t, 0)),
                pl.BlockSpec((None, TQ, C), lambda b, t: (b, t, 0)),
                pl.BlockSpec((None, TQ, C), lambda b, t: (b, t, 0)),
            ),
        ),
        compiler_params=_compiler_params(("parallel", "parallel"), qkv_est),
    )(x, ln1_w, w_q, w_k, w_v)

    # ------------------ pass 2: causal flash attention --------------------
    attn_est = (2 * TQ * C * 2 + 4 * TQ * C * 2 + 4 * TQ * C * 4 + 2 * C * C * 2
                + 2 * H * TQ * TQ * 4 + H * TQ * (Dh + 2) * 4)
    x1 = pl.pallas_call(
        functools.partial(flash_attn_kernel, num_heads=num_heads),
        out_shape=jax.ShapeDtypeStruct((B, T, C), jnp.float32),
        grid_spec=pltpu.PrefetchScalarGridSpec(
            num_scalar_prefetch=0,
            grid=(B, NQ, NQ),                 # (batch, q tiles, kv tiles)
            in_specs=[
                pl.BlockSpec((None, TQ, C), lambda b, qi, kv: (b, qi, 0)),   # q
                # K/V tiles streamed; index clamped to the diagonal so tiles
                # past the causal boundary are never re-fetched.
                pl.BlockSpec((None, TQ, C),
                             lambda b, qi, kv: (b, jnp.minimum(kv, qi), 0)),  # k
                pl.BlockSpec((None, TQ, C),
                             lambda b, qi, kv: (b, jnp.minimum(kv, qi), 0)),  # v
                pl.BlockSpec((None, TQ, C), lambda b, qi, kv: (b, qi, 0)),   # x (residual)
                pl.BlockSpec((C, C), lambda b, qi, kv: (0, 0)),              # W_attn_proj
            ],
            out_specs=pl.BlockSpec((None, TQ, C), lambda b, qi, kv: (b, qi, 0)),
            scratch_shapes=[
                pltpu.VMEM((H, TQ, 1), jnp.float32),    # running max
                pltpu.VMEM((H, TQ, 1), jnp.float32),    # running denom
                pltpu.VMEM((H, TQ, Dh), jnp.float32),   # running numerator
            ],
        ),
        compiler_params=_compiler_params(("parallel", "parallel", "arbitrary"),
                                         attn_est),
    )(q, k, v, x, w_ap)

    # ------------------ pass 3: LN2 + FFN (streamed weights) --------------
    mlp_est = (4 * TQ * C * 4 + 4 * (C * FT + FT * C) * 2
               + TQ * C * (2 + 4) + 2 * TQ * FT * 4)
    out = pl.pallas_call(
        mlp_kernel,
        out_shape=jax.ShapeDtypeStruct((B, T, C), jnp.float32),
        grid_spec=pltpu.PrefetchScalarGridSpec(
            num_scalar_prefetch=0,
            grid=(B, NQ, NF),                 # (batch, row tiles, ff chunks)
            in_specs=[
                pl.BlockSpec((None, TQ, C), lambda b, t, f: (b, t, 0)),   # x1
                pl.BlockSpec((1, C), lambda b, t, f: (0, 0)),             # ln2 w
                pl.BlockSpec((C, FT), lambda b, t, f: (0, f)),            # W_fc chunk
                pl.BlockSpec((FT, C), lambda b, t, f: (f, 0)),            # W_proj chunk
            ],
            out_specs=pl.BlockSpec((None, TQ, C), lambda b, t, f: (b, t, 0)),
            scratch_shapes=[
                pltpu.VMEM((TQ, C), jnp.bfloat16),   # LN2(x1), computed once per tile
                pltpu.VMEM((TQ, C), jnp.float32),    # FFN accumulator
            ],
        ),
        compiler_params=_compiler_params(("parallel", "parallel", "arbitrary"),
                                         mlp_est),
    )(x1, ln2_w, w_f, w_p)
    return out


# --------------------------------------------------------------------------
# Pure-JAX f32 reference matching the PyTorch module (eval semantics)
# --------------------------------------------------------------------------
def reference_block(x, params, num_heads):
    ln1_w, w_attn, w_aproj, ln2_w, w_fc, w_proj = params
    B, T, C = x.shape
    H = num_heads
    Dh = C // H

    def ln(v, w):
        mu = jnp.mean(v, -1, keepdims=True)
        var = jnp.mean((v - mu) ** 2, -1, keepdims=True)
        return (v - mu) / jnp.sqrt(var + 1e-5) * w

    xn = ln(x, ln1_w[0])
    qkv = xn @ w_attn
    q, k, v = jnp.split(qkv, 3, axis=-1)
    q = q.reshape(B, T, H, Dh).transpose(0, 2, 1, 3)
    k = k.reshape(B, T, H, Dh).transpose(0, 2, 1, 3)
    v = v.reshape(B, T, H, Dh).transpose(0, 2, 1, 3)
    att = (q @ jnp.swapaxes(k, -1, -2)) / math.sqrt(Dh)
    mask = jnp.tril(jnp.ones((T, T), bool))
    att = jnp.where(mask, att, -jnp.inf)
    att = jax.nn.softmax(att, axis=-1)
    y = (att @ v).transpose(0, 2, 1, 3).reshape(B, T, C)
    x1 = x + y @ w_aproj
    xn2 = ln(x1, ln2_w[0])
    h = xn2 @ w_fc
    h = 0.5 * h * (1.0 + jax.lax.erf(h / math.sqrt(2.0)))
    return x1 + h @ w_proj


if __name__ == "__main__":
    B, T, C, H = 2, 8, 32, 4   # batch, seq (== block_size), embed, heads

    key = jax.random.PRNGKey(0)
    kx, k1, k2, k3, k4 = jax.random.split(key, 5)

    x = jax.random.normal(kx, (B, T, C), dtype=jnp.float32)

    # PyTorch nn.Linear stores W as (out, in) and computes x @ W.T; we store
    # the transposed (in, out) form.
    std = 0.02
    ln1_w = jnp.ones((1, C), jnp.float32)    # LayerNorm weight (bias=False)
    ln2_w = jnp.ones((1, C), jnp.float32)
    w_attn = std * jax.random.normal(k1, (C, 3 * C), dtype=jnp.float32)
    w_aproj = std * jax.random.normal(k2, (C, C), dtype=jnp.float32)
    w_fc = std * jax.random.normal(k3, (C, 4 * C), dtype=jnp.float32)
    w_proj = std * jax.random.normal(k4, (4 * C, C), dtype=jnp.float32)

    params = (ln1_w, w_attn, w_aproj, ln2_w, w_fc, w_proj)

    # TODO(synk): dropout layers are treated as identity (eval mode);
    # training-mode stochastic dropout is not implemented.
    out = jax.block_until_ready(transformer_block(x, params, H))

    ref = reference_block(x, params, H)
    assert out.shape == (B, T, C)
    max_err = float(jnp.max(jnp.abs(out - ref)))
    assert jnp.allclose(out, ref, atol=1e-2, rtol=1e-2), (
        f"mismatch vs reference (max abs err {max_err})")

    print("KERNEL_OK")
</pallas_src>

<mosaic_0001>
module attributes {stable_mosaic.version = 11 : i64} {
  func.func @qkv_proj_kernel(%arg0: i32, %arg1: i32, %arg2: memref<1x8x32xf32, #tpu.memory_space<vmem>>, %arg3: memref<1x32xf32, #tpu.memory_space<vmem>>, %arg4: memref<32x32xbf16, #tpu.memory_space<vmem>>, %arg5: memref<32x32xbf16, #tpu.memory_space<vmem>>, %arg6: memref<32x32xbf16, #tpu.memory_space<vmem>>, %arg7: memref<1x8x32xbf16, #tpu.memory_space<vmem>>, %arg8: memref<1x8x32xbf16, #tpu.memory_space<vmem>>, %arg9: memref<1x8x32xbf16, #tpu.memory_space<vmem>>) attributes {dimension_semantics = [#tpu.dimension_semantics<parallel>, #tpu.dimension_semantics<parallel>], iteration_bounds = array<i64: 2, 1>, scalar_prefetch = 0 : i64, scratch_operands = 0 : i64, tpu.core_type = #tpu.core_type<tc>, window_params = [{transform_indices = @transform_0, window_bounds = array<i64: 1, 8, 32>}, {pipeline_mode = #tpu.pipeline_mode<synchronous>, transform_indices = @transform_1, window_bounds = array<i64: 1, 32>}, {pipeline_mode = #tpu.pipeline_mode<synchronous>, transform_indices = @transform_2, window_bounds = array<i64: 32, 32>}, {pipeline_mode = #tpu.pipeline_mode<synchronous>, transform_indices = @transform_3, window_bounds = array<i64: 32, 32>}, {pipeline_mode = #tpu.pipeline_mode<synchronous>, transform_indices = @transform_4, window_bounds = array<i64: 32, 32>}, {transform_indices = @transform_5, window_bounds = array<i64: 1, 8, 32>}, {transform_indices = @transform_6, window_bounds = array<i64: 1, 8, 32>}, {transform_indices = @transform_7, window_bounds = array<i64: 1, 8, 32>}]} {
    %c0 = arith.constant 0 : index
    %c0_0 = arith.constant 0 : index
    %c0_1 = arith.constant 0 : index
    %0 = vector.load %arg2[%c0, %c0_0, %c0_1] : memref<1x8x32xf32, #tpu.memory_space<vmem>>, vector<1x8x32xf32>
    %1 = vector.shape_cast %0 : vector<1x8x32xf32> to vector<8x32xf32>
    %c0_2 = arith.constant 0 : index
    %c0_3 = arith.constant 0 : index
    %2 = vector.load %arg3[%c0_2, %c0_3] : memref<1x32xf32, #tpu.memory_space<vmem>>, vector<1x32xf32>
    %cst = arith.constant dense<0.000000e+00> : vector<8xf32>
    %3 = vector.multi_reduction <add>, %1, %cst [1] : vector<8x32xf32> to vector<8xf32>
    %4 = vector.shape_cast %3 : vector<8xf32> to vector<8x1xf32>
    %cst_4 = arith.constant 3.200000e+01 : f32
    %5 = vector.broadcast %cst_4 : f32 to vector<8x1xf32>
    %6 = arith.divf %4, %5 : vector<8x1xf32>
    %7 = vector.broadcast %6 : vector<8x1xf32> to vector<8x32xf32>
    %8 = arith.subf %1, %7 : vector<8x32xf32>
    %9 = arith.mulf %8, %8 : vector<8x32xf32>
    %cst_5 = arith.constant dense<0.000000e+00> : vector<8xf32>
    %10 = vector.multi_reduction <add>, %9, %cst_5 [1] : vector<8x32xf32> to vector<8xf32>
    %11 = vector.shape_cast %10 : vector<8xf32> to vector<8x1xf32>
    %cst_6 = arith.constant 3.200000e+01 : f32
    %12 = vector.broadcast %cst_6 : f32 to vector<8x1xf32>
    %13 = arith.divf %11, %12 : vector<8x1xf32>
    %14 = vector.broadcast %6 : vector<8x1xf32> to vector<8x32xf32>
    %15 = arith.subf %1, %14 : vector<8x32xf32>
    %cst_7 = arith.constant 9.99999974E-6 : f32
    %16 = vector.broadcast %cst_7 : f32 to vector<8x1xf32>
    %17 = arith.addf %13, %16 : vector<8x1xf32>
    %18 = math.rsqrt %17 : vector<8x1xf32>
    %19 = vector.broadcast %18 : vector<8x1xf32> to vector<8x32xf32>
    %20 = arith.mulf %15, %19 : vector<8x32xf32>
    %21 = vector.broadcast %2 : vector<1x32xf32> to vector<8x32xf32>
    %22 = arith.mulf %20, %21 : vector<8x32xf32>
    %23 = arith.truncf %22 : vector<8x32xf32> to vector<8x32xbf16>
    %c0_8 = arith.constant 0 : index
    %c0_9 = arith.constant 0 : index
    %24 = vector.load %arg4[%c0_8, %c0_9] : memref<32x32xbf16, #tpu.memory_space<vmem>>, vector<32x32xbf16>
    %cst_10 = arith.constant dense<0.000000e+00> : vector<8x32xf32>
    %25 = tpu.matmul %23, %24, %cst_10 {dimension_numbers = #tpu.dot_dimension_numbers<[1], [0], [0], [1], [0, 0, 1, 1], [], []>} : vector<8x32xbf16>, vector<32x32xbf16>, vector<8x32xf32> -> vector<8x32xf32>
    %cst_11 = arith.constant 0.353553385 : f32
    %26 = vector.broadcast %cst_11 : f32 to vector<8x32xf32>
    %27 = arith.mulf %25, %26 : vector<8x32xf32>
    %28 = arith.truncf %27 : vector<8x32xf32> to vector<8x32xbf16>
    %c0_12 = arith.constant 0 : index
    %c0_13 = arith.constant 0 : index
    %c0_14 = arith.constant 0 : index
    %29 = vector.load %arg7[%c0_12, %c0_13, %c0_14] : memref<1x8x32xbf16, #tpu.memory_space<vmem>>, vector<1x8x32xbf16>
    %30 = vector.shape_cast %29 : vector<1x8x32xbf16> to vector<8x32xbf16>
    %31 = vector.shape_cast %28 : vector<8x32xbf16> to vector<1x8x32xbf16>
    tpu.vector_store %arg7[%c0_12, %c0_13, %c0_14], %31 {strides = array<i32>} : memref<1x8x32xbf16, #tpu.memory_space<vmem>>, vector<1x8x32xbf16>,
    %c0_15 = arith.constant 0 : index
    %c0_16 = arith.constant 0 : index
    %32 = vector.load %arg5[%c0_15, %c0_16] : memref<32x32xbf16, #tpu.memory_space<vmem>>, vector<32x32xbf16>
    %cst_17 = arith.constant dense<0.000000e+00> : vector<8x32xf32>
    %33 = tpu.matmul %23, %32, %cst_17 {dimension_numbers = #tpu.dot_dimension_numbers<[1], [0], [0], [1], [0, 0, 1, 1], [], []>} : vector<8x32xbf16>, vector<32x32xbf16>, vector<8x32xf32> -> vector<8x32xf32>
    %34 = arith.truncf %33 : vector<8x32xf32> to vector<8x32xbf16>
    %c0_18 = arith.constant 0 : index
    %c0_19 = arith.constant 0 : index
    %c0_20 = arith.constant 0 : index
    %35 = vector.load %arg8[%c0_18, %c0_19, %c0_20] : memref<1x8x32xbf16, #tpu.memory_space<vmem>>, vector<1x8x32xbf16>
    %36 = vector.shape_cast %35 : vector<1x8x32xbf16> to vector<8x32xbf16>
    %37 = vector.shape_cast %34 : vector<8x32xbf16> to vector<1x8x32xbf16>
    tpu.vector_store %arg8[%c0_18, %c0_19, %c0_20], %37 {strides = array<i32>} : memref<1x8x32xbf16, #tpu.memory_space<vmem>>, vector<1x8x32xbf16>,
    %c0_21 = arith.constant 0 : index
    %c0_22 = arith.constant 0 : index
    %38 = vector.load %arg6[%c0_21, %c0_22] : memref<32x32xbf16, #tpu.memory_space<vmem>>, vector<32x32xbf16>
    %cst_23 = arith.constant dense<0.000000e+00> : vector<8x32xf32>
    %39 = tpu.matmul %23, %38, %cst_23 {dimension_numbers = #tpu.dot_dimension_numbers<[1], [0], [0], [1], [0, 0, 1, 1], [], []>} : vector<8x32xbf16>, vector<32x32xbf16>, vector<8x32xf32> -> vector<8x32xf32>
    %40 = arith.truncf %39 : vector<8x32xf32> to vector<8x32xbf16>
    %c0_24 = arith.constant 0 : index
    %c0_25 = arith.constant 0 : index
    %c0_26 = arith.constant 0 : index
    %41 = vector.load %arg9[%c0_24, %c0_25, %c0_26] : memref<1x8x32xbf16, #tpu.memory_space<vmem>>, vector<1x8x32xbf16>
    %42 = vector.shape_cast %41 : vector<1x8x32xbf16> to vector<8x32xbf16>
    %43 = vector.shape_cast %40 : vector<8x32xbf16> to vector<1x8x32xbf16>
    tpu.vector_store %arg9[%c0_24, %c0_25, %c0_26], %43 {strides = array<i32>} : memref<1x8x32xbf16, #tpu.memory_space<vmem>>, vector<1x8x32xbf16>,
    return
  }
  func.func @transform_0(%arg0: i32, %arg1: i32) -> (i32, i32, i32) {
    %c0_i32 = arith.constant 0 : i32
    %c0_i32_0 = arith.constant 0 : i32
    return %arg0, %arg1, %c0_i32 : i32, i32, i32
  }
  func.func @transform_1(%arg0: i32, %arg1: i32) -> (i32, i32) {
    %c0_i32 = arith.constant 0 : i32
    %c0_i32_0 = arith.constant 0 : i32
    %c0_i32_1 = arith.constant 0 : i32
    return %c0_i32, %c0_i32_0 : i32, i32
  }
  func.func @transform_2(%arg0: i32, %arg1: i32) -> (i32, i32) {
    %c0_i32 = arith.constant 0 : i32
    %c0_i32_0 = arith.constant 0 : i32
    %c0_i32_1 = arith.constant 0 : i32
    return %c0_i32, %c0_i32_0 : i32, i32
  }
  func.func @transform_3(%arg0: i32, %arg1: i32) -> (i32, i32) {
    %c0_i32 = arith.constant 0 : i32
    %c0_i32_0 = arith.constant 0 : i32
    %c0_i32_1 = arith.constant 0 : i32
    return %c0_i32, %c0_i32_0 : i32, i32
  }
  func.func @transform_4(%arg0: i32, %arg1: i32) -> (i32, i32) {
    %c0_i32 = arith.constant 0 : i32
    %c0_i32_0 = arith.constant 0 : i32
    %c0_i32_1 = arith.constant 0 : i32
    return %c0_i32, %c0_i32_0 : i32, i32
  }
  func.func @transform_5(%arg0: i32, %arg1: i32) -> (i32, i32, i32) {
    %c0_i32 = arith.constant 0 : i32
    %c0_i32_0 = arith.constant 0 : i32
    return %arg0, %arg1, %c0_i32 : i32, i32, i32
  }
  func.func @transform_6(%arg0: i32, %arg1: i32) -> (i32, i32, i32) {
    %c0_i32 = arith.constant 0 : i32
    %c0_i32_0 = arith.constant 0 : i32
    return %arg0, %arg1, %c0_i32 : i32, i32, i32
  }
  func.func @transform_7(%arg0: i32, %arg1: i32) -> (i32, i32, i32) {
    %c0_i32 = arith.constant 0 : i32
    %c0_i32_0 = arith.constant 0 : i32
    return %arg0, %arg1, %c0_i32 : i32, i32, i32
  }
}

</mosaic_0001>

<bundles_post_ra>
// kernel: tpu_custom_call.1
= control target key start
LH: loop header
LB: loop body
LE: loop exit
PB: predicated region body
PF: predicated region fallthrough
CT: control target
= control target key end

     0   :  { %s1688_s0 = inlined_call_operand.hbm [shape: f32[2,8,32], index: 0, kind: input, shape index: {}]   ;;  %s1689_s1 = inlined_call_operand.vmem [shape: f32[1,32], index: 1, kind: input, shape index: {}]   ;;  %s1690_s2 = inlined_call_operand.hbm [shape: bf16[32,32], index: 2, kind: input, shape index: {}]   ;;  %s1691_s3 = inlined_call_operand.hbm [shape: bf16[32,32], index: 3, kind: input, shape index: {}]   ;;  %s1692_s4 = inlined_call_operand.hbm [shape: bf16[32,32], index: 4, kind: input, shape index: {}]   ;;  %s1693_s5 = inlined_call_operand.hbm [shape: bf16[2,8,32], index: 5, kind: output, shape index: {0}]   ;;  %s1694_s6 = inlined_call_operand.hbm [shape: bf16[2,8,32], index: 6, kind: output, shape index: {1}]   ;;  %s1695_s7 = inlined_call_operand.hbm [shape: bf16[2,8,32], index: 7, kind: output, shape index: {2}]  }
   0x1   :  { %1703 = sst [smem:[#allocation21_spill]] %s1695_s7 }
   0x2   :  { %13 = vsyncpa [#allocation3], 0 }
   0x3   :  { %15 = vsyncpa [#allocation3 + $0x1], 0 }
   0x4   :  { %16 = vsyncpa [#allocation6], 0 }
   0x5   :  { %17 = vsyncpa [#allocation9], 0 }
   0x6   :  { %18 = vsyncpa [#allocation4], 0 }
   0x7   :  { %20 = vsyncpa [#allocation4 + $0x1], 0 }
   0x8   :  { %21 = vsyncpa [#allocation12], 0 }
   0x9   :  { %23 = vsyncpa [#allocation12 + $0x1], 0  ;;  %s1307_s24 = smov 0   ;;  %s1309_s25 = smov 0  }
   0xa   :  { %s1311_s26 = smov 0   ;;  %s1313_s27 = smov 0  }
   0xb   :  { %s1315_s28 = smov 0   ;;  %s1317_s29 = smov 0  }
   0xc LB: > { %1704 = sst [smem:[#allocation19_spill]] %s1234_s24  ;;  %s1338_s30 = sadd.s32 4294967295, %s1254_s29   ;;  %s1254_s29 = sphi %s1317_s29, %s29_s29   ;;  %s1250_s28 = sphi %s1315_s28, %s1730_s28   ;;  %s1246_s27 = sphi %s1313_s27, %s1729_s27   ;;  %s1242_s26 = sphi %s1311_s26, %s1728_s26   ;;  %s1238_s25 = sphi %s1309_s25, %s1727_s25   ;;  %s1234_s24 = sphi %s1307_s24, %s1726_s24  }
   0xd   : > { %s1697_s8 = sadd.s32 4294967294, %s1254_s29   ;;  %p63_p0 = scmp.ne.s32.totalorder %s1238_s25, %s1234_s24 }
   0xe   : > { %p1696_p1 = scmp.eq.s32.totalorder %s1338_s30, 0  ;;  %p179_p3 = scmp.eq.s32.totalorder %s1697_s8, 1 }
   0xf   : > { %p809_p5 = scmp.ge.s32.totalorder %s1254_s29, 1  ;;  %p242_p7 = scmp.lt.s32.totalorder %s1254_s29, 3 }
  0x10   : > { %p1349_p4 = por %p1696_p1, %p63_p0  ;;  %p1354_p6 = por %p179_p3, %p63_p0 }
  0x11   : > { %p1359_p8 = pnand %p809_p5, %p242_p7  ;;  %s1256_s12 = smov [#allocation5]  }
  0x12   : > { %s1705_s9 = scalar_select %p1349_p4, 1, 0 }
  0x13   : > { %s1706_s10 = scalar_select %p1354_p6, 1, 0 }
  0x14   : > { %s1708_s11 = scalar_select %p1359_p8, 1, 0 }
  0x15   : > { %1707 = sst [smem:[#allocation20_spill]] %s1706_s10  ;;  %s257_s13 = sshll.u32 %s1256_s12, 4  ;;  %s1363_s13 = int_to_ptr.vmem [resolvable:$true] %s257_s13 }
  0x16   : > { %p895_p9 = pneg %p1359_p8  ;;  %s1257_s15 = smov [#allocation7]  }
  0x17   : > { %s270_s16 = sshll.u32 %s1257_s15, 4  ;;  %s1258_s17 = smov [#allocation8]   ;;  %s1374_s16 = int_to_ptr.vmem [resolvable:$true] %s270_s16 }
  0x18   : > { %p1370_p11 = pnand %p895_p9, %p1696_p1  ;;  %s1376_s18 = sshll.u32 %s1258_s17, 4  ;;  %s284_s18 = int_to_ptr.vmem [resolvable:$true] %s1376_s18 }
  0x19   : > { %s990_s21 = scalar_lea.hbm %s1690_s2, 256 }
  0x1a   : > { %p991_p12 = scmp.ne.s32.totalorder %s1690_s2, %s990_s21  ;;  %p1386_p13 = pneg %p1370_p11 }
  0x1b   : > { %p997_p5 = scmp.lt.u32.totalorder %s990_s21, %s1690_s2 }
  0x1c   : > { %p993_p0 = pnand %p1386_p13, %p991_p12 }
  0x1e   : > { %p994_p3 = pneg %p993_p0 }
  0x20   : > { %p999_p7 = pnand %p997_p5, %p994_p3 }
  0x22   : > { %1002 = shalt.err (!%p999_p7)
}
  0x23   : > { %s1003_s19 = scalar_lea.vmem %s1363_s13, 256  ;;  %p1011_p2 = scmp.lt.s32.totalorder %s1363_s13, %s1363_s13 }
  0x24   : > { %p1004_p9 = scmp.ne.s32.totalorder %s1363_s13, %s1003_s19  ;;  %p1012_p6 = scmp.lt.s32.totalorder %s1003_s19, %s1003_s19 }
  0x26   : > { %p1006_p10 = pnand %p1004_p9, %p1386_p13  ;;  %p1013_p12 = por %p1012_p6, %p1011_p2 }
  0x28   : > { %p1007_p1 = pneg %p1006_p10 }
  0x2a   : > { %p1014_p0 = pnand %p1013_p12, %p1007_p1 }
  0x2c   : > { %1017 = shalt.err (!%p1014_p0)
}
  0x2d   : > { %s1259_s20 = smov 64   ;;  %s1260_s21 = smov 4  }
  0x2e   : > { %898 = dma.hbm_to_vmem [thread:$0]  (!%p1370_p11), %s1690_s2, 256, %s1363_s13, [#allocation6], %s1259_s20, %s1259_s20, %s1260_s21  }
  0x2f   : > { %s1018_s19 = scalar_lea.hbm %s1691_s3, 256 }
  0x30   : > { %p1019_p1 = scmp.ne.s32.totalorder %s1691_s3, %s1018_s19  ;;  %p1025_p10 = scmp.lt.u32.totalorder %s1018_s19, %s1691_s3 }
  0x32   : > { %p1021_p2 = pnand %p1019_p1, %p1386_p13 }
  0x34   : > { %p1022_p6 = pneg %p1021_p2 }
  0x36   : > { %p1027_p3 = pnand %p1025_p10, %p1022_p6 }
  0x38   : > { %1030 = shalt.err (!%p1027_p3)
}
  0x39   : > { %s1031_s13 = scalar_lea.vmem %s1374_s16, 256  ;;  %p1039_p12 = scmp.lt.s32.totalorder %s1374_s16, %s1374_s16 }
  0x3a   : > { %p1032_p5 = scmp.ne.s32.totalorder %s1374_s16, %s1031_s13  ;;  %p1040_p0 = scmp.lt.s32.totalorder %s1031_s13, %s1031_s13 }
  0x3c   : > { %p1034_p7 = pnand %p1032_p5, %p1386_p13  ;;  %p1041_p1 = por %p1040_p0, %p1039_p12 }
  0x3e   : > { %p1035_p9 = pneg %p1034_p7 }
  0x40   : > { %p1042_p2 = pnand %p1041_p1, %p1035_p9 }
  0x42   : > { %1045 = shalt.err (!%p1042_p2)
}
  0x43   : > { %901 = dma.hbm_to_vmem [thread:$0]  (!%p1370_p11), %s1691_s3, 256, %s1374_s16, [#allocation6], %s1259_s20, %s1259_s20, %s1260_s21  }
  0x44   : > { %s1046_s22 = scalar_lea.hbm %s1692_s4, 256 }
  0x45   : > { %p1047_p6 = scmp.ne.s32.totalorder %s1692_s4, %s1046_s22  ;;  %p1053_p5 = scmp.lt.u32.totalorder %s1046_s22, %s1692_s4 }
  0x47   : > { %p1049_p10 = pnand %p1047_p6, %p1386_p13 }
  0x49   : > { %p1050_p3 = pneg %p1049_p10 }
  0x4b   : > { %p1055_p7 = pnand %p1053_p5, %p1050_p3 }
  0x4d   : > { %1058 = shalt.err (!%p1055_p7)
}
  0x4e   : > { %s1059_s13 = scalar_lea.vmem %s284_s18, 256  ;;  %p1067_p1 = scmp.lt.s32.totalorder %s284_s18, %s284_s18 }
  0x4f   : > { %p1060_p9 = scmp.ne.s32.totalorder %s284_s18, %s1059_s13  ;;  %p1068_p2 = scmp.lt.s32.totalorder %s1059_s13, %s1059_s13 }
  0x51   : > { %p1062_p12 = pnand %p1060_p9, %p1386_p13  ;;  %p1069_p4 = por %p1068_p2, %p1067_p1 }
  0x53   : > { %p1063_p0 = pneg %p1062_p12 }
  0x55   : > { %p1070_p8 = pnand %p1069_p4, %p1063_p0 }
  0x57   : > { %1073 = shalt.err (!%p1070_p8)
}
  0x58   : > { %904 = dma.hbm_to_vmem [thread:$0]  (!%p1370_p11), %s1692_s4, 256, %s284_s18, [#allocation9], %s1259_s20, %s1259_s20, %s1260_s21  }
  0x59   : > { %s50_s12 = sadd.s32 1, %s1242_s26  ;;  %s41_s14 = sadd.s32 1, %s1250_s28 }
  0x5a   : > { %p57_p4 = scmp.ne.s32.totalorder %s1242_s26, %s1238_s25  ;;  %p43_p8 = scmp.ge.s32.totalorder %s41_s14, 2 }
  0x5b   : > { %p58_p13 = scmp.eq.s32.totalorder %s1254_s29, 0  ;;  %p1711_p6 = scmp.eq.s32.totalorder %s1338_s30, 1 }
  0x5c   : > { %p922_p3 = scmp.lt.s32.totalorder %s1254_s29, 2  ;;  %s1732_s14 = smov (%p43_p8, %s41_s14), 0 }
  0x5d   : > { %p1465_p10 = por %p1711_p6, %p57_p4  ;;  %p59_p5 = por %p58_p13, %p57_p4 }
  0x5e   : > { %s297_s8 = sand.u32 1, %s1242_s26   ;;  %s45_s10 = ssub.s32 %s1250_s28, %s1732_s14 }
  0x5f   : > { %p48_p7 = scmp.eq.s32.totalorder %s45_s10, 0  ;;  %s814_s18 = sshll.u32 %s297_s8, 3 }
  0x60   : > { %s815_s20 = sshll.u32 %s1250_s28, 7  ;;  %s301_s17 = scalar_lea.vmem [#allocation2], %s814_s18 }
  0x61   : > { %s1477_s21 = scalar_select %p48_p7, %s1242_s26, %s50_s12  }
  0x62   : > { %s1482_s15 = scalar_lea.hbm %s1688_s0, %s815_s20  ;;  %s309_s19 = sshll.u32 %s301_s17, 4  ;;  %s1484_s19 = int_to_ptr.vmem [resolvable:$true] %s309_s19 }
  0x63   : > { %p1488_p11 = pnand %p922_p3, %p59_p5  ;;  %s298_s16 = scalar_lea.sflag [#allocation3], %s297_s8 }
  0x64   : > { %s1074_s7 = scalar_lea.hbm %s1482_s15, 128  ;;  %s1079_s18 = scalar_lea.hbm %s1688_s0, 256 }
  0x65   : > { %p1075_p9 = scmp.ne.s32.totalorder %s1482_s15, %s1074_s7  ;;  %p1076_p12 = pneg %p1488_p11 }
  0x66   : > { %p1080_p2 = scmp.lt.u32.totalorder %s1482_s15, %s1688_s0  ;;  %p1081_p4 = scmp.lt.u32.totalorder %s1079_s18, %s1074_s7 }
  0x67   : > { %p1077_p0 = pnand %p1076_p12, %p1075_p9  ;;  %p1083_p13 = scmp.lt.u32.totalorder %s1074_s7, %s1482_s15 }
  0x68   : > { %p1082_p8 = por %p1081_p4, %p1080_p2 }
  0x69   : > { %p1078_p1 = pneg %p1077_p0 }
  0x6a   : > { %p1084_p6 = por %p1083_p13, %p1082_p8 }
  0x6c   : > { %p1085_p3 = pnand %p1084_p6, %p1078_p1 }
  0x6e   : > { %1088 = shalt.err (!%p1085_p3)
}
  0x6f   : > { %s1089_s8 = scalar_lea.vmem %s1484_s19, 128  ;;  %s1261_s23 = smov [#allocation2]  }
  0x70   : > { %p1090_p5 = scmp.ne.s32.totalorder %s1484_s19, %s1089_s8  ;;  %s1094_s17 = sshll.u32 %s1261_s23, 4  ;;  %s1095_s17 = int_to_ptr.vmem [resolvable:$false] %s1094_s17 }
  0x71   : > { %s1096_s12 = scalar_lea.vmem %s1095_s17, 256  ;;  %p1097_p0 = scmp.lt.s32.totalorder %s1484_s19, %s1095_s17 }
  0x72   : > { %p1092_p7 = pnand %p1090_p5, %p1076_p12  ;;  %p1098_p2 = scmp.lt.s32.totalorder %s1096_s12, %s1089_s8 }
  0x74   : > { %p1093_p9 = pneg %p1092_p7  ;;  %p1099_p4 = por %p1098_p2, %p1097_p0 }
  0x76   : > { %p1100_p8 = pnand %p1099_p4, %p1093_p9 }
  0x78   : > { %1103 = shalt.err (!%p1100_p8)
}
  0x79   : > { %908 = dma.hbm_to_vmem [thread:$0]  (!%p1488_p11), %s1482_s15, 128, %s1484_s19, %s298_s16  }
  0x7a   : > { %p1714_p1 = scmp.ne.s32.totalorder %s1708_s11, 0 }
  0x7b   : > { %s1520_s7 = sand.u32 (!%p1714_p1), 1, %s1238_s25   ;;  %p1715_p12 = scmp.ne.s32.totalorder (!%p1714_p1), %s1705_s9, 0 }
  0x7c   : > { %318 = sbr.rel (%p1714_p1) target bundleno = 731 (0x2db), region = 40  ;;  %s817_s10 = sshll.u32 (!%p1714_p1), %s1520_s7, 3 }
  0x7d   : > { %s321_s18 = scalar_lea.sflag (!%p1714_p1), [#allocation3], %s1520_s7  ;;  %s324_s20 = scalar_lea.vmem (!%p1714_p1), [#allocation2], %s817_s10 }
  0x83   : > { %1213 = dma.done.wait (%p1715_p12), %s321_s18, 128  }
  0x84   : > { %1215 = vsyncadd (%p1715_p12), %s321_s18, 4294967168  ;;  %p1716_p13 = scmp.eq.s32.totalorder %s1338_s30, 0 }
  0x86   : > { %1217 = dma.done.wait (%p1716_p13), [#allocation6], 512   ;;  %p1717_p11 = pmov %p1716_p13 }
  0x88   : > { %1219 = vsyncadd (%p1717_p11), [#allocation6], 4294966784  ;;  %p1718_p6 = pmov %p1717_p11 }
  0x8a   : > { %1221 = dma.done.wait (%p1718_p6), [#allocation9], 256   ;;  %p1719_p3 = pmov %p1718_p6 }
  0x8b   : > { %vm380_vm0 = vcmask 261120   ;;  %v378_v0 = vld [vmem:[%s324_s20] sm:$0xff]  ;;  %v982_v7 = vld [vmem:[#allocation5] sm:$0xff]   ;;  %v1262_v9 = vmov 0.0   ;;  %v984_v10 = vld [vmem:[#allocation5 + $0x8] sm:$0xff]   ;;  %vm1263_vm1 = vmmov 0  }
  0x8c   : > { %1223 = vsyncadd (%p1719_p3), [#allocation9], 4294967040  ;;  %v381_v1 = vsel %vm380_vm0, %v378_v0, 0.0  ;;  %v983_v8 = vld [vmem:[#allocation7] sm:$0xff]   ;;  %851 = vmatprep.subr.bf16.mxu0 %v1262_v9  ;;  %859 = vmatprep.subr.bf16.mxu1 %v1262_v9  ;;  %v985_v11 = vld [vmem:[#allocation7 + $0x8] sm:$0xff]   ;;  %s1548_s15 = sshll.u32 %s1520_s7, 2 }
  0x8d   : > { %382 = vadd.xlane.f32.xlu0 %v381_v1  ;;  %852 = vmatpush3.bf16.msra.mxu0 %v982_v7  ;;  %v824_v16 = vld [vmem:[%s1689_s1] ss:$0 sm:$0xff]  ;;  %v986_v19 = vld [vmem:[#allocation8] sm:$0xff]   ;;  %v987_v21 = vld [vmem:[#allocation8 + $0x8] sm:$0xff]   ;;  %s587_s19 = sand.u32 1, %s1338_s30   ;;  %s1552_s13 = sshll.u32 %s1246_s27, 6 }
  0x8e   : > { %860 = vmatpush3.bf16.msra.mxu1 %v983_v8  ;;  %853 = vmatprep.subr.bf16.mxu0 %v1262_v9  ;;  %s369_s16 = scalar_lea.vmem [#allocation11], %s1548_s15  ;;  %vm464_vm2 = vcmask 257024   ;;  %s362_s8 = scalar_lea.vmem [#allocation10], %s1548_s15 }
  0x8f   : > { %861 = vmatprep.subr.bf16.mxu1 %v1262_v9  ;;  %855 = vmatprep.mubr.msk.bf16.mxu0 %vm1263_vm1, %v1262_v9  ;;  %s621_s22 = sshll.u32 %s369_s16, 4  ;;  %s607_s23 = sshll.u32 %s362_s8, 4  ;;  %s1564_s22 = int_to_ptr.vmem [resolvable:$true] %s621_s22  ;;  %s1573_s23 = int_to_ptr.vmem [resolvable:$true] %s607_s23 }
  0x90   : > { %863 = vmatprep.mubr.msk.bf16.mxu1 %vm1263_vm1, %v1262_v9  ;;  %s1562_s27 = scalar_lea.hbm %s1694_s6, %s1552_s13  ;;  %s1571_s18 = scalar_lea.hbm %s1693_s5, %s1552_s13 }
  0x91   : > { %854 = vmatpush3.bf16.msra.mxu0 %v984_v10  ;;  %s1575_s20 = scalar_lea.sflag [#allocation12], %s587_s19  ;;  %s1104_s9 = scalar_lea.vmem %s1564_s22, 64 }
  0x92   : > { %862 = vmatpush3.bf16.msra.mxu1 %v985_v11  ;;  %867 = vmatprep.subr.bf16.mxu0 %v1262_v9  ;;  %p1105_p5 = scmp.ne.s32.totalorder %s1564_s22, %s1104_s9  ;;  %s1264_s11 = smov [#allocation11]  }
  0x93   : > { %s1108_s17 = sshll.u32 %s1264_s11, 4  ;;  %s1109_s17 = int_to_ptr.vmem [resolvable:$false] %s1108_s17 }
  0x94   : > { %p1106_p7 = pnand %p1105_p5, %p1465_p10  ;;  %s1110_s12 = scalar_lea.vmem %s1109_s17, 128 }
  0x95   : > { %p1111_p0 = scmp.lt.s32.totalorder %s1564_s22, %s1109_s17  ;;  %p1112_p2 = scmp.lt.s32.totalorder %s1110_s12, %s1104_s9 }
  0x96   : > { %p1107_p9 = pneg %p1106_p7 }
  0x97   : > { %p1113_p4 = por %p1112_p2, %p1111_p0 }
  0x99   : > { %p1114_p8 = pnand %p1113_p4, %p1107_p9 }
 0x11a   : > { %v383_v2 = vpop.xlane.xlu0 %382 }
 0x11b   : > { %v385_v3 = vmul.f32 0.03125, %v383_v2 }
 0x11d   : > { %v386_v4 = vsub.f32 %v378_v0, %v385_v3 }
 0x11f   : > { %v387_v5 = vmul.f32 %v386_v4, %v386_v4 }
 0x121   : > { %v388_v6 = vsel %vm380_vm0, %v387_v5, 0.0 }
 0x122   : > { %389 = vadd.xlane.f32.xlu0 %v388_v6 }
 0x1af   : > { %v390_v12 = vpop.xlane.xlu0 %389 }
 0x1b0   : > { %v391_v13 = vmul.f32 0.03125, %v390_v12 }
 0x1b2   : > { %v392_v14 = vadd.f32 1e-05, %v391_v13 }
 0x1b4   : > { %988 = vrsqrt.f32 %v392_v14 }
 0x1be   : > { %v989_v15 = vpop.eup %988 }
 0x1bf   : > { %v394_v17 = vmul.f32 %v989_v15, %v386_v4 }
 0x1c1   : > { %v401_v18 = vmul.f32 %v824_v16, %v394_v17 }
 0x1c3   : > { %v402_v20 = vpack.c.bf16 %v401_v18, %v401_v18 }
 0x1c5   : > { %856 = vmatmul.mubr.msk.bf16.vlgmr.msra.gmra.mrb[0].mxu0 %vm380_vm0, %v402_v20  ;;  %864 = vmatmul.mubr.msk.bf16.vlgmr.msra.gmra.mrb[0].mxu1 %vm380_vm0, %v402_v20 }
 0x1c6   : > { %868 = vmatpush3.bf16.msra.mxu0 %v986_v19  ;;  %871 = vmatprep.mubr.msk.bf16.mxu0 %vm1263_vm1, %v1262_v9 }
 0x1c7   : > { %869 = vmatprep.subr.bf16.mxu0 %v1262_v9 }
 0x1ca   : > { %870 = vmatpush3.bf16.msra.mxu0 %v987_v21 }
 0x1cd   : > { %872 = vmatmul.mubr.msk.bf16.vlgmr.msra.gmra.mrb[4].mxu0 %vm380_vm0, %v402_v20 }
 0x298   : > { %v456_v22 = vpop.f32.mrb[0].mxu0  ;;  %v516_v23 = vpop.f32.mrb[0].mxu1 }
 0x299   : > { %v462_v24 = vmul.f32 0.35355338, %v456_v22  ;;  %v522_v25 = vpack.c.bf16 %v516_v23, %v516_v23  ;;  %v857_v26 = vpop.f32.mrb[1].mxu0  ;;  %v865_v27 = vpop.f32.mrb[1].mxu1 }
 0x29a   : > { %v459_v28 = vpop.f32.mrb[2].mxu0  ;;  %v519_v29 = vpop.f32.mrb[2].mxu1 }
 0x29b   : > { %v463_v30 = vpack.c.bf16 %v462_v24, %v462_v24  ;;  %v858_v31 = vpop.f32.mrb[3].mxu0  ;;  %v866_v32 = vpop.f32.mrb[3].mxu1  ;;  %523 = vst.msk [vmem:[%s369_s16] sm:$0xf] %vm464_vm2, %v522_v25 }
 0x29c   : > { %1117 = shalt.err (!%p1114_p8)
}
 0x29d   : > { %s1118_s19 = scalar_lea.hbm %s1562_s27, 64  ;;  %s1122_s10 = scalar_lea.hbm %s1694_s6, 128 }
 0x29e   : > { %p1119_p1 = scmp.ne.s32.totalorder %s1562_s27, %s1118_s19  ;;  %p1123_p11 = scmp.lt.u32.totalorder %s1562_s27, %s1694_s6 }
 0x29f   : > { %p1124_p6 = scmp.lt.u32.totalorder %s1122_s10, %s1118_s19  ;;  %p1126_p5 = scmp.lt.u32.totalorder %s1118_s19, %s1562_s27 }
 0x2a0   : > { %p1120_p12 = pnand %p1119_p1, %p1465_p10 }
 0x2a1   : > { %p1125_p3 = por %p1124_p6, %p1123_p11 }
 0x2a2   : > { %p1121_p13 = pneg %p1120_p12 }
 0x2a3   : > { %p1127_p7 = por %p1126_p5, %p1125_p3 }
 0x2a5   : > { %p1128_p9 = pnand %p1127_p7, %p1121_p13 }
 0x2a7   : > { %1131 = shalt.err (!%p1128_p9)
}
 0x2a8   : > { %890 = dma.vmem_to_hbm [thread:$0]  (%p1465_p10), %s1564_s22, 64, %s1562_s27, %s1575_s20   ;;  %465 = vst.msk [vmem:[%s362_s8] sm:$0xf] %vm464_vm2, %v463_v30 }
 0x2a9   : > { %s376_s9 = scalar_lea.vmem [#allocation13], %s1548_s15  ;;  %s583_s19 = scalar_lea.sflag [#allocation4], %s1520_s7 }
 0x2aa   : > { %s1605_s12 = sshll.u32 %s376_s9, 4  ;;  %s1132_s16 = scalar_lea.vmem %s1573_s23, 64  ;;  %s1636_s12 = int_to_ptr.vmem [resolvable:$true] %s1605_s12 }
 0x2ab   : > { %p1133_p0 = scmp.ne.s32.totalorder %s1573_s23, %s1132_s16  ;;  %s1265_s30 = smov [#allocation10]  }
 0x2ac   : > { %s1136_s10 = sshll.u32 %s1265_s30, 4  ;;  %s1137_s10 = int_to_ptr.vmem [resolvable:$false] %s1136_s10 }
 0x2ad   : > { %p1134_p2 = pnand %p1133_p0, %p1465_p10  ;;  %s1138_s11 = scalar_lea.vmem %s1137_s10, 128 }
 0x2ae   : > { %p1139_p8 = scmp.lt.s32.totalorder %s1573_s23, %s1137_s10  ;;  %p1140_p1 = scmp.lt.s32.totalorder %s1138_s11, %s1132_s16 }
 0x2af   : > { %p1135_p4 = pneg %p1134_p2 }
 0x2b0   : > { %p1141_p12 = por %p1140_p1, %p1139_p8 }
 0x2b2   : > { %p1142_p13 = pnand %p1141_p12, %p1135_p4 }
 0x2b4   : > { %1145 = shalt.err (!%p1142_p13)
}
 0x2b5   : > { %s1146_s7 = scalar_lea.hbm %s1571_s18, 64  ;;  %s1150_s27 = scalar_lea.hbm %s1693_s5, 128 }
 0x2b6   : > { %p1147_p11 = scmp.ne.s32.totalorder %s1571_s18, %s1146_s7  ;;  %p1151_p5 = scmp.lt.u32.totalorder %s1571_s18, %s1693_s5 }
 0x2b7   : > { %p1152_p7 = scmp.lt.u32.totalorder %s1150_s27, %s1146_s7  ;;  %p1154_p0 = scmp.lt.u32.totalorder %s1146_s7, %s1571_s18 }
 0x2b8   : > { %p1148_p6 = pnand %p1147_p11, %p1465_p10 }
 0x2b9   : > { %p1153_p9 = por %p1152_p7, %p1151_p5 }
 0x2ba   : > { %p1149_p3 = pneg %p1148_p6 }
 0x2bb   : > { %p1155_p2 = por %p1154_p0, %p1153_p9 }
 0x2bd   : > { %p1156_p4 = pnand %p1155_p2, %p1149_p3 }
 0x2bf   : > { %1159 = shalt.err (!%p1156_p4)
}
 0x2c0   : > { %889 = dma.vmem_to_hbm [thread:$0]  (%p1465_p10), %s1573_s23, 64, %s1571_s18, %s583_s19   ;;  %v574_v33 = vpop.f32.mrb[4].mxu0 }
 0x2c1   : > { %v580_v34 = vpack.c.bf16 %v574_v33, %v574_v33  ;;  %v873_v35 = vpop.f32.mrb[5].mxu0  ;;  %s1720_s11 = sld [smem:[#allocation21_spill]]  ;;  %s1160_s7 = scalar_lea.vmem %s1636_s12, 64 }
 0x2c2   : > { %v577_v36 = vpop.f32.mrb[6].mxu0  ;;  %p1161_p8 = scmp.ne.s32.totalorder %s1636_s12, %s1160_s7  ;;  %s1266_s23 = smov [#allocation13]  }
 0x2c3   : > { %v874_v37 = vpop.f32.mrb[7].mxu0  ;;  %581 = vst.msk [vmem:[%s376_s9] sm:$0xf] %vm464_vm2, %v580_v34  ;;  %s1164_s18 = sshll.u32 %s1266_s23, 4  ;;  %s1165_s18 = int_to_ptr.vmem [resolvable:$false] %s1164_s18 }
 0x2c4   : > { %p1162_p1 = pnand %p1161_p8, %p1465_p10  ;;  %p1167_p13 = scmp.lt.s32.totalorder %s1636_s12, %s1165_s18 }
 0x2c6   : > { %p1163_p12 = pneg %p1162_p1 }
 0x2c7   : > { %s1633_s22 = scalar_lea.hbm %s1720_s11, %s1552_s13  ;;  %s1166_s13 = scalar_lea.vmem %s1165_s18, 128 }
 0x2c8   : > { %p1168_p11 = scmp.lt.s32.totalorder %s1166_s13, %s1160_s7 }
 0x2ca   : > { %p1169_p6 = por %p1168_p11, %p1167_p13 }
 0x2cc   : > { %p1170_p3 = pnand %p1169_p6, %p1163_p12 }
 0x2ce   : > { %1173 = shalt.err (!%p1170_p3)
}
 0x2cf   : > { %s1174_s15 = scalar_lea.hbm %s1633_s22, 64  ;;  %s1178_s8 = scalar_lea.hbm %s1720_s11, 128 }
 0x2d0   : > { %p1175_p5 = scmp.ne.s32.totalorder %s1633_s22, %s1174_s15  ;;  %p1179_p0 = scmp.lt.u32.totalorder %s1633_s22, %s1720_s11 }
 0x2d1   : > { %p1180_p2 = scmp.lt.u32.totalorder %s1178_s8, %s1174_s15  ;;  %p1182_p8 = scmp.lt.u32.totalorder %s1174_s15, %s1633_s22 }
 0x2d2   : > { %p1176_p7 = pnand %p1175_p5, %p1465_p10 }
 0x2d3   : > { %p1181_p4 = por %p1180_p2, %p1179_p0 }
 0x2d4   : > { %p1177_p9 = pneg %p1176_p7 }
 0x2d5   : > { %p1183_p1 = por %p1182_p8, %p1181_p4 }
 0x2d7   : > { %p1184_p12 = pnand %p1183_p1, %p1177_p9 }
 0x2d9   : > { %1187 = shalt.err (!%p1184_p12)
}
 0x2da   : > { %891 = dma.vmem_to_hbm [thread:$0]  (%p1465_p10), %s1636_s12, 64, %s1633_s22, %s1575_s20  }
 0x2db PF: > { %s1721_s30 = sld [smem:[#allocation19_spill]]  ;;  %s1722_s16 = sld [smem:[#allocation20_spill]] }
 0x2dc   : > { %p1724_p11 = scmp.ge.s32.totalorder %s1254_s29, 2 }
 0x2e1   : > { %s647_s10 = sand.u32 1, %s1721_s30   ;;  %p1723_p13 = scmp.ne.s32.totalorder %s1722_s16, 0 }
 0x2e2   : > { %s648_s7 = scalar_lea.sflag [#allocation4], %s647_s10 }
 0x2e3   : > { %p910_p6 = pnand %p1724_p11, %p1723_p13 }
 0x2e5   : > { %1225 = dma.done.wait (!%p910_p6), %s648_s7, 64  }
 0x2e6   : > { %1227 = vsyncadd (!%p910_p6), %s648_s7, 4294967232  ;;  %s1725_s23 = sadd.s32 4294967294, %s1254_s29  }
 0x2e7   : > { %s656_s18 = sand.u32 1, %s1725_s23  }
 0x2e8   : > { %s657_s13 = scalar_lea.sflag [#allocation12], %s656_s18 }
 0x2e9   : > { %1229 = dma.done.wait (!%p910_p6), %s657_s13, 128  }
 0x2ea   : > { %1231 = vsyncadd (!%p910_p6), %s657_s13, 4294967168  ;;  %s29_s29 = sadd.s32 1, %s1254_s29   ;;  %s1726_s24 = smov %s1238_s25 }
 0x2eb   : > { %p26_p10 = scmp.ge.s32.totalorder %s29_s29, 4   ;;  %s1727_s25 = smov %s1242_s26 }
 0x2ec   : > { %s1728_s26 = smov %s1477_s21  ;;  %s1729_s27 = smov %s1250_s28 }
 0x2ed   : > { %s1730_s28 = smov %s1732_s14  ;;  %28 = sbr.rel (!%p26_p10) target bundleno = 12 (0xc), region = 129 }
 0x2f4   :  { %671 = vsyncpa [#allocation3], 1 }
 0x2f5   :  { %673 = vsyncpa [#allocation3 + $0x1], 1 }
 0x2f6   :  { %674 = vsyncpa [#allocation6], 1 }
 0x2f7   :  { %675 = vsyncpa [#allocation9], 1 }
 0x2f8   :  { %676 = vsyncpa [#allocation4], 1 }
 0x2f9   :  { %678 = vsyncpa [#allocation4 + $0x1], 1 }
 0x2fa   :  { %679 = vsyncpa [#allocation12], 1 }
 0x2fb   :  { %681 = vsyncpa [#allocation12 + $0x1], 1 }

</bundles_post_ra>
